<compile_context>
chip_gen: v6e
topology: v6e:2x2x1
jax: 0.10.0
libtpu: 0.0.40
codegen_flags: <defaults>
</compile_context>

<pallas_src>
import jax
import jax.numpy as jnp
from jax.experimental import pallas as pl

LANE = 128     # lane width (last dim)
SUBLANE = 8    # f32 sublane width (second-last dim)


def _round_up(n, m):
    return ((n + m - 1) // m) * m


def _full_spec(shape):
    """Whole-array VMEM block (gridless call): index_map returns the origin."""
    return pl.BlockSpec(shape, lambda: tuple(0 for _ in shape))


# --------------------------------------------------------------------------
# One-time parameter prep (hoisted out of every forward call)
# --------------------------------------------------------------------------

def prepare_rnncell_params(w_ih, w_hh, b_ih, b_hh):
    """Pre-transpose, zero-pad the lane (hidden) dim to 128, fuse the biases.

    Returns:
      w_ih_t  : (I,     H_pad)  = W_ih^T, lane-padded
      w_hh_t  : (H_pad, H_pad)  = W_hh^T, padded on both axes
      b_fused : (1,     H_pad)  = b_ih + b_hh, lane-padded
    """
    H, I = w_ih.shape
    H_pad = _round_up(H, LANE)
    w_ih_t = jnp.pad(jnp.transpose(w_ih), ((0, 0), (0, H_pad - H)))
    w_hh_t = jnp.pad(jnp.transpose(w_hh), ((0, H_pad - H), (0, H_pad - H)))
    b_fused = jnp.pad((b_ih + b_hh).reshape(1, H), ((0, 0), (0, H_pad - H)))
    return w_ih_t, w_hh_t, b_fused


# --------------------------------------------------------------------------
# Single RNNCell step  (== Model.forward(input, hidden))
# --------------------------------------------------------------------------

def rnncell_step_kernel(x_ref, h_ref, w_ih_ref, w_hh_ref, b_ref, out_ref):
    pre = (
        jnp.dot(x_ref[...], w_ih_ref[...], preferred_element_type=jnp.float32)
        + jnp.dot(h_ref[...], w_hh_ref[...], preferred_element_type=jnp.float32)
        + b_ref[...]
    )
    out_ref[...] = jnp.tanh(pre).astype(out_ref.dtype)


@jax.jit
def rnncell_forward(x, h, w_ih_t, w_hh_t, b_fused):
    """x: (B, I), h: (B, H) -> new hidden (B, H). Padded to (8, 128) tiles."""
    B, I = x.shape
    H = h.shape[1]
    H_pad = w_hh_t.shape[1]
    B_pad = _round_up(max(B, SUBLANE), SUBLANE)

    x_p = jnp.pad(x, ((0, B_pad - B), (0, 0)))
    h_p = jnp.pad(h, ((0, B_pad - B), (0, H_pad - H)))

    out = pl.pallas_call(
        rnncell_step_kernel,
        out_shape=jax.ShapeDtypeStruct((B_pad, H_pad), x.dtype),
        in_specs=[
            _full_spec((B_pad, I)),        # x
            _full_spec((B_pad, H_pad)),    # h
            _full_spec((I, H_pad)),        # W_ih^T
            _full_spec((H_pad, H_pad)),    # W_hh^T
            _full_spec((1, H_pad)),        # fused bias
        ],
        out_specs=_full_spec((B_pad, H_pad)),
    )(x_p, h_p, w_ih_t, w_hh_t, b_fused)
    return out[:B, :H]


# --------------------------------------------------------------------------
# Whole sequence in ONE pallas_call, ONE grid iteration:
# everything resident in VMEM, lax.fori_loop over time inside the kernel.
# --------------------------------------------------------------------------

def rnn_sequence_kernel(x_ref, w_ih_ref, w_hh_ref, b_ref, hT_ref):
    w_ih = w_ih_ref[...]
    w_hh = w_hh_ref[...]
    b = b_ref[...]
    T = x_ref.shape[0]

    def step(t, h):
        pre = (
            jnp.dot(x_ref[t], w_ih, preferred_element_type=jnp.float32)
            + jnp.dot(h, w_hh, preferred_element_type=jnp.float32)
            + b
        )
        return jnp.tanh(pre)

    h0 = jnp.zeros(hT_ref.shape, jnp.float32)            # Model.init_hidden(): zeros
    hT = jax.lax.fori_loop(0, T, step, h0, unroll=True)  # short fixed trip count
    hT_ref[...] = hT.astype(hT_ref.dtype)                 # single output store


@jax.jit
def rnn_sequence_forward(x_seq, w_ih_t, w_hh_t, b_fused):
    """x_seq: (T, B, I). Runs T RNNCell steps (h0 = zeros); returns (B_pad, H_pad)."""
    T, B, I = x_seq.shape
    H_pad = w_hh_t.shape[1]
    B_pad = _round_up(max(B, SUBLANE), SUBLANE)
    x_p = jnp.pad(x_seq, ((0, 0), (0, B_pad - B), (0, 0)))

    return pl.pallas_call(
        rnn_sequence_kernel,
        out_shape=jax.ShapeDtypeStruct((B_pad, H_pad), x_seq.dtype),
        in_specs=[
            _full_spec((T, B_pad, I)),     # whole sequence resident in VMEM
            _full_spec((I, H_pad)),        # W_ih^T
            _full_spec((H_pad, H_pad)),    # W_hh^T
            _full_spec((1, H_pad)),        # fused bias
        ],
        out_specs=_full_spec((B_pad, H_pad)),
    )(x_p, w_ih_t, w_hh_t, b_fused)


# --------------------------------------------------------------------------
# Pure-JAX references
# --------------------------------------------------------------------------

def rnncell_reference(x, h, w_ih, w_hh, b_ih, b_hh):
    return jnp.tanh(x @ w_ih.T + b_ih + h @ w_hh.T + b_hh)


def rnn_sequence_reference(x_seq, w_ih, w_hh, b_ih, b_hh):
    h = jnp.zeros((x_seq.shape[1], w_hh.shape[0]), x_seq.dtype)
    for t in range(x_seq.shape[0]):
        h = rnncell_reference(x_seq[t], h, w_ih, w_hh, b_ih, b_hh)
    return h


if __name__ == "__main__":
    # Module hyperparameters (from the PyTorch script).
    batch_size = 1
    input_size = 4
    hidden_size = 4
    seq_len = 8  # for the sequence-in-one-kernel demonstration

    key = jax.random.PRNGKey(0)
    k_x, k_h, k_wih, k_whh, k_bih, k_bhh, k_seq = jax.random.split(key, 7)

    # Deterministic init, matching PyTorch RNNCell's U(-1/sqrt(H), 1/sqrt(H)).
    bound = 1.0 / (hidden_size ** 0.5)
    w_ih = jax.random.uniform(k_wih, (hidden_size, input_size), jnp.float32, -bound, bound)
    w_hh = jax.random.uniform(k_whh, (hidden_size, hidden_size), jnp.float32, -bound, bound)
    b_ih = jax.random.uniform(k_bih, (hidden_size,), jnp.float32, -bound, bound)
    b_hh = jax.random.uniform(k_bhh, (hidden_size,), jnp.float32, -bound, bound)

    x = jax.random.normal(k_x, (batch_size, input_size), jnp.float32)
    h = jax.random.normal(k_h, (batch_size, hidden_size), jnp.float32)

    # One-time parameter prep (shared by both paths).
    w_ih_t, w_hh_t, b_fused = prepare_rnncell_params(w_ih, w_hh, b_ih, b_hh)

    # --- single RNNCell step (== Model.forward) ---
    out = jax.block_until_ready(rnncell_forward(x, h, w_ih_t, w_hh_t, b_fused))
    ref = rnncell_reference(x, h, w_ih, w_hh, b_ih, b_hh)
    assert out.shape == (batch_size, hidden_size)
    assert jnp.allclose(out, ref, atol=1e-5, rtol=1e-5), "step mismatch vs reference"

    # --- whole sequence inside one pallas_call, one grid iteration ---
    x_seq = jax.random.normal(k_seq, (seq_len, batch_size, input_size), jnp.float32)
    hT_full = jax.block_until_ready(rnn_sequence_forward(x_seq, w_ih_t, w_hh_t, b_fused))
    hT = hT_full[:batch_size, :hidden_size]
    ref_seq = rnn_sequence_reference(x_seq, w_ih, w_hh, b_ih, b_hh)
    assert jnp.allclose(hT, ref_seq, atol=1e-5, rtol=1e-5), "sequence mismatch vs reference"

    print("KERNEL_OK")
</pallas_src>

<mosaic_0001>
module attributes {stable_mosaic.version = 11 : i64} {
  func.func @rnncell_step_kernel(%arg0: memref<8x4xf32, #tpu.memory_space<vmem>>, %arg1: memref<8x128xf32, #tpu.memory_space<vmem>>, %arg2: memref<4x128xf32, #tpu.memory_space<vmem>>, %arg3: memref<128x128xf32, #tpu.memory_space<vmem>>, %arg4: memref<1x128xf32, #tpu.memory_space<vmem>>, %arg5: memref<8x128xf32, #tpu.memory_space<vmem>>) attributes {dimension_semantics = [], scalar_prefetch = 0 : i64, scratch_operands = 0 : i64, tpu.core_type = #tpu.core_type<tc>} {
    %c0 = arith.constant 0 : index
    %c0_0 = arith.constant 0 : index
    %0 = vector.load %arg0[%c0, %c0_0] : memref<8x4xf32, #tpu.memory_space<vmem>>, vector<8x4xf32>
    %c0_1 = arith.constant 0 : index
    %c0_2 = arith.constant 0 : index
    %1 = vector.load %arg2[%c0_1, %c0_2] : memref<4x128xf32, #tpu.memory_space<vmem>>, vector<4x128xf32>
    %cst = arith.constant dense<0.000000e+00> : vector<8x128xf32>
    %2 = tpu.matmul %0, %1, %cst {dimension_numbers = #tpu.dot_dimension_numbers<[1], [0], [0], [1], [0, 0, 1, 1], [], []>} : vector<8x4xf32>, vector<4x128xf32>, vector<8x128xf32> -> vector<8x128xf32>
    %c0_3 = arith.constant 0 : index
    %c0_4 = arith.constant 0 : index
    %3 = vector.load %arg1[%c0_3, %c0_4] : memref<8x128xf32, #tpu.memory_space<vmem>>, vector<8x128xf32>
    %c0_5 = arith.constant 0 : index
    %c0_6 = arith.constant 0 : index
    %4 = vector.load %arg3[%c0_5, %c0_6] : memref<128x128xf32, #tpu.memory_space<vmem>>, vector<128x128xf32>
    %cst_7 = arith.constant dense<0.000000e+00> : vector<8x128xf32>
    %5 = tpu.matmul %3, %4, %cst_7 {dimension_numbers = #tpu.dot_dimension_numbers<[1], [0], [0], [1], [0, 0, 1, 1], [], []>} : vector<8x128xf32>, vector<128x128xf32>, vector<8x128xf32> -> vector<8x128xf32>
    %6 = arith.addf %2, %5 : vector<8x128xf32>
    %c0_8 = arith.constant 0 : index
    %c0_9 = arith.constant 0 : index
    %7 = vector.load %arg4[%c0_8, %c0_9] : memref<1x128xf32, #tpu.memory_space<vmem>>, vector<1x128xf32>
    %8 = vector.broadcast %7 : vector<1x128xf32> to vector<8x128xf32>
    %9 = arith.addf %6, %8 : vector<8x128xf32>
    %10 = math.tanh %9 : vector<8x128xf32>
    %c0_10 = arith.constant 0 : index
    %c0_11 = arith.constant 0 : index
    %11 = vector.load %arg5[%c0_10, %c0_11] : memref<8x128xf32, #tpu.memory_space<vmem>>, vector<8x128xf32>
    tpu.vector_store %arg5[%c0_10, %c0_11], %10 {strides = array<i32>} : memref<8x128xf32, #tpu.memory_space<vmem>>, vector<8x128xf32>,
    return
  }
}

</mosaic_0001>

<bundles_post_ra>
// kernel: rnncell_forward.1
= control target key start
LH: loop header
LB: loop body
LE: loop exit
PB: predicated region body
PF: predicated region fallthrough
CT: control target
= control target key end

     0   :  { %10 = vsyncpa [#allocation3], 0  ;;  %s307_s18 = smov [#allocation2]   ;;  %s360_s0 = inlined_call_operand.vmem [shape: f32[8,4], index: 0, kind: input, shape index: {}]   ;;  %s361_s1 = inlined_call_operand.vmem [shape: f32[8,128], index: 1, kind: input, shape index: {}]   ;;  %s362_s2 = inlined_call_operand.vmem [shape: f32[4,128], index: 2, kind: input, shape index: {}]   ;;  %s363_s3 = inlined_call_operand.hbm [shape: f32[128,128], index: 3, kind: input, shape index: {}]   ;;  %s364_s4 = inlined_call_operand.vmem [shape: f32[1,128], index: 4, kind: input, shape index: {}]   ;;  %s365_s5 = inlined_call_operand.vmem [shape: f32[8,128], index: 5, kind: output, shape index: {}]  }
   0x1   :  { %s22_s19 = sshll.u32 %s307_s18, 4  ;;  %s23_s19 = int_to_ptr.vmem [resolvable:$true] %s22_s19 }
   0x2   :  { %s293_s20 = scalar_lea.vmem %s23_s19, 2048  ;;  %p298_p1 = scmp.lt.s32.totalorder %s23_s19, %s23_s19 }
   0x3   :  { %p294_p0 = scmp.ne.s32.totalorder %s23_s19, %s293_s20  ;;  %p299_p2 = scmp.lt.s32.totalorder %s293_s20, %s293_s20 }
   0x5   :  { %p300_p3 = por %p299_p2, %p298_p1 }
   0x7   :  { %p301_p4 = pnand %p300_p3, %p294_p0 }
   0x9   :  { %304 = shalt.err (!%p301_p4)
}
   0xa   :  { %s308_s21 = smov 128   ;;  %s309_s22 = smov 8  }
   0xb   :  { %28 = dma.hbm_to_vmem [thread:$0]  %s363_s3, 2048, %s23_s19, [#allocation3], %s308_s21, %s308_s21, %s309_s22  }
   0xc   :  { %305 = dma.done.wait [#allocation3], 2048  }
   0xd   :  { %306 = vsyncadd [#allocation3], 4294965248  ;;  %v310_v0 = vmov 0.0   ;;  %vm311_vm0 = vmmov 0   ;;  %v52_v1 = vld [vmem:[#allocation2 + $0x78] sm:$0xff]  ;;  %v51_v2 = vld [vmem:[#allocation2 + $0x70] sm:$0xff] }
   0xe   :  { %238 = vmatprep.subr.mxu0 %v310_v0  ;;  %273 = vmatprep.subr.mxu1 %v310_v0  ;;  %v50_v3 = vld [vmem:[#allocation2 + $0x68] sm:$0xff]  ;;  %vm127_vm1 = vcmask 1043456   ;;  %v49_v4 = vld [vmem:[#allocation2 + $0x60] sm:$0xff]  ;;  %vm123_vm2 = vcmask 31744   ;;  %v48_v7 = vld [vmem:[#allocation2 + $0x58] sm:$0xff] }
   0xf   :  { %275 = vmatprep.mubr.msk.f32.mxu1 %vm311_vm0, %v310_v0  ;;  %270 = vmatprep.mubr.msk.f32.mxu0 %vm311_vm0, %v310_v0  ;;  %v35_v5 = vld [vmem:[%s362_s2] sm:$0xf]  ;;  %v47_v8 = vld [vmem:[#allocation2 + $0x50] sm:$0xff]  ;;  %v46_v9 = vld [vmem:[#allocation2 + $0x48] sm:$0xff] }
  0x10   :  { %239 = vmatpush3.msra.mxu0 %v52_v1  ;;  %v34_v6 = vld [vmem:[%s360_s0] sm:$0xff]  ;;  %274 = vmatpush3.msk.msra.mxu1 %vm127_vm1, %v35_v5  ;;  %v44_v11 = vld [vmem:[#allocation2 + $0x38] sm:$0xff]  ;;  %v43_v12 = vld [vmem:[#allocation2 + $0x30] sm:$0xff] }
  0x11   :  { %240 = vmatprep.subr.mxu0 %v310_v0  ;;  %276 = vmatmul.mubr.msk.f32.vlgmr.msra.gmra.mxu1 %vm123_vm2, %v34_v6  ;;  %v45_v10 = vld [vmem:[#allocation2 + $0x40] sm:$0xff]  ;;  %v42_v13 = vld [vmem:[#allocation2 + $0x28] sm:$0xff]  ;;  %v40_v15 = vld [vmem:[#allocation2 + $0x18] sm:$0xff] }
  0x12   :  { %241 = vmatpush3.msra.mxu0 %v51_v2  ;;  %v41_v14 = vld [vmem:[#allocation2 + $0x20] sm:$0xff]  ;;  %v39_v16 = vld [vmem:[#allocation2 + $0x10] sm:$0xff]  ;;  %v38_v17 = vld [vmem:[#allocation2 + $0x8] sm:$0xff] }
  0x13   :  { %242 = vmatprep.subr.mxu0 %v310_v0  ;;  %v37_v18 = vld [vmem:[#allocation2] sm:$0xff] }
  0x14   :  { %243 = vmatpush3.msra.mxu0 %v50_v3  ;;  %v36_v19 = vld [vmem:[%s361_s1] sm:$0xff] }
  0x15   :  { %244 = vmatprep.subr.mxu0 %v310_v0  ;;  %v218_v23 = vld [vmem:[%s364_s4] ss:$0 sm:$0xff] }
  0x16   :  { %245 = vmatpush3.msra.mxu0 %v49_v4 }
  0x17   :  { %246 = vmatprep.subr.mxu0 %v310_v0 }
  0x18   :  { %247 = vmatpush3.msra.mxu0 %v48_v7 }
  0x19   :  { %248 = vmatprep.subr.mxu0 %v310_v0 }
  0x1a   :  { %249 = vmatpush3.msra.mxu0 %v47_v8 }
  0x1b   :  { %250 = vmatprep.subr.mxu0 %v310_v0 }
  0x1c   :  { %251 = vmatpush3.msra.mxu0 %v46_v9 }
  0x1d   :  { %252 = vmatprep.subr.mxu0 %v310_v0 }
  0x1e   :  { %253 = vmatpush3.msra.mxu0 %v45_v10 }
  0x1f   :  { %254 = vmatprep.subr.mxu0 %v310_v0 }
  0x20   :  { %255 = vmatpush3.msra.mxu0 %v44_v11 }
  0x21   :  { %256 = vmatprep.subr.mxu0 %v310_v0 }
  0x22   :  { %257 = vmatpush3.msra.mxu0 %v43_v12 }
  0x23   :  { %258 = vmatprep.subr.mxu0 %v310_v0 }
  0x24   :  { %259 = vmatpush3.msra.mxu0 %v42_v13 }
  0x25   :  { %260 = vmatprep.subr.mxu0 %v310_v0 }
  0x26   :  { %261 = vmatpush3.msra.mxu0 %v41_v14 }
  0x27   :  { %262 = vmatprep.subr.mxu0 %v310_v0 }
  0x28   :  { %263 = vmatpush3.msra.mxu0 %v40_v15 }
  0x29   :  { %264 = vmatprep.subr.mxu0 %v310_v0 }
  0x2a   :  { %265 = vmatpush3.msra.mxu0 %v39_v16 }
  0x2b   :  { %266 = vmatprep.subr.mxu0 %v310_v0 }
  0x2c   :  { %267 = vmatpush3.msra.mxu0 %v38_v17 }
  0x2d   :  { %268 = vmatprep.subr.mxu0 %v310_v0 }
  0x2e   :  { %269 = vmatpush3.msra.mxu0 %v37_v18 }
  0x2f   :  { %271 = vmatmul.mubr.f32.vlgmr.msra.gmra.mxu0 %v36_v19 }
  0xd1   :  { %v197_v20 = vpop.f32.mrf.mxu1 }
  0xd3   :  { %v277_v21 = vpop.f32.mrf.mxu1 }
  0xef   :  { %v119_v22 = vpop.f32.mrf.mxu0 }
  0xf0   :  { %v198_v24 = vadd.f32 %v197_v20, %v119_v22 }
  0xf1   :  { %v272_v25 = vpop.f32.mrf.mxu0 }
  0xf2   :  { %v208_v26 = vadd.f32 %v218_v23, %v198_v24 }
  0xf4   :  { %283 = vtanh.f32 %v208_v26 }
 0x101   :  { %v284_v27 = vpop.eup %283 }
 0x102   :  { %210 = vst [vmem:[%s365_s5] sm:$0xff] %v284_v27 }
 0x103   :  { %215 = vsyncpa [#allocation3], 1 }

</bundles_post_ra>
